<compile_context>
chip_gen: v6e
topology: v6e:2x2x1
jax: 0.10.0
libtpu: 0.0.40
codegen_flags: <defaults>
</compile_context>

<pallas_src>
import functools
import math

import jax
import jax.numpy as jnp
from jax.experimental import pallas as pl
from jax.experimental.pallas import tpu as pltpu


def _mha_kernel(x_ref, w_ref, o_ref, *, head_num, att_d, seq_len, batch_tile,
                scaling, use_residual, operand_dtype):
    F = seq_len
    E = head_num * att_d
    bt = batch_tile

    # (bt, F, E) -> (bt*F, E): rows for the fused projection matmul.
    x = x_ref[...].reshape(bt * F, E).astype(operand_dtype)
    w = w_ref[...].astype(operand_dtype)                       # (E, 3E or 4E)

    # 1. fused Q/K/V(/R) projection: a single lane-dense MXU matmul.
    qkvr = jnp.dot(x, w, preferred_element_type=jnp.float32)   # (bt*F, 3E|4E)

    q = qkvr[:, 0 * E:1 * E]
    k = qkvr[:, 1 * E:2 * E]
    v = qkvr[:, 2 * E:3 * E]
    if scaling:
        q = q * (1.0 / math.sqrt(att_d))     # fold the scale into Q once

    q3 = q.reshape(bt, F, E)
    k3 = k.reshape(bt, F, E)
    v3 = v.reshape(bt, F, E)

    # 2./3. scaled dot-product attention, batched over the bt batch elements
    # of this block.  head_num is a small static constant, so a short unrolled
    # loop of bt-batched 3-D einsums is used (same MXU work as a 4-D
    # head-batched einsum, fewer relayouts).
    head_outs = []
    for h in range(head_num):
        lo = h * att_d
        hi = lo + att_d
        qh = q3[:, :, lo:hi]                                   # (bt, F, d)
        kh = k3[:, :, lo:hi]
        vh = v3[:, :, lo:hi]
        s = jnp.einsum('bfd,bgd->bfg', qh, kh,
                       preferred_element_type=jnp.float32)     # (bt, F, F)
        s = s - jnp.max(s, axis=-1, keepdims=True)
        p = jnp.exp(s)
        inv = pl.reciprocal(jnp.sum(p, axis=-1, keepdims=True), approx=True)
        ctx = jnp.einsum('bfg,bgd->bfd', p, vh,
                         preferred_element_type=jnp.float32)   # (bt, F, d)
        head_outs.append(ctx * inv)          # fold 1/denom in as a row scale

    # 4. concat heads back along the embedding dim -> (bt, F, E)
    res = jnp.concatenate(head_outs, axis=-1)

    if use_residual:
        res = res + qkvr[:, 3 * E:4 * E].reshape(bt, F, E)

    out = jnp.tanh(res)
    # Lane-dense store: the last block dim is F*E (a multiple of 128 here).
    o_ref[...] = out.reshape(bt, 1, F * E).astype(o_ref.dtype)


def _pick_batch_tile(batch, seq_len, target_rows=256):
    """Batch elements per grid step: aim for ~target_rows rows per block,
    keep >=2 grid steps when possible (v7x has 2 TensorCores), divide B."""
    bt = max(1, min(batch, target_rows // max(seq_len, 1)))
    if batch >= 2:
        bt = min(bt, max(1, batch // 2))
    while batch % bt:
        bt -= 1
    return bt


def multihead_attention(x, w_q, w_k, w_v, w_r=None, *, head_num,
                        scaling=True, use_residual=True,
                        batch_tile=None, operand_dtype=jnp.float32):
    """x: (B, F, E); w_*: (E, E).  Returns tanh(multi-head attention (+ res))."""
    B, F, E = x.shape
    assert E % head_num == 0, 'emb_dim must be divisible by head_num'
    d = E // head_num

    weights = [w_q, w_k, w_v]
    if use_residual:
        assert w_r is not None, 'use_residual=True requires W_R'
        weights.append(w_r)
    w_all = jnp.concatenate(weights, axis=1)        # (E, 3E) or (E, 4E)

    if batch_tile is None:
        # NOTE: on v7x (64 MiB VMEM) prefer roughly half the v6e target_rows;
        # on v6e/v7x pass operand_dtype=jnp.bfloat16 for bf16 MXU operands.
        batch_tile = _pick_batch_tile(B, F)
    assert B % batch_tile == 0, 'batch_tile must divide the batch size'

    kernel = functools.partial(
        _mha_kernel, head_num=head_num, att_d=d, seq_len=F,
        batch_tile=batch_tile, scaling=scaling, use_residual=use_residual,
        operand_dtype=operand_dtype)

    out_flat = pl.pallas_call(
        kernel,
        out_shape=jax.ShapeDtypeStruct((B, 1, F * E), jnp.float32),
        grid=(B // batch_tile,),
        in_specs=[
            pl.BlockSpec((batch_tile, F, E), lambda i: (i, 0, 0)),   # inputs
            pl.BlockSpec(w_all.shape, lambda i: (0, 0)),             # fused W
        ],
        out_specs=pl.BlockSpec((batch_tile, 1, F * E), lambda i: (i, 0, 0)),
        compiler_params=pltpu.CompilerParams(
            dimension_semantics=("parallel",),
            vmem_limit_bytes=32 * 1024 * 1024),
    )(x, w_all)

    return out_flat.reshape(B, F, E)


def _reference(x, w_q, w_k, w_v, w_r, *, head_num, scaling=True, use_residual=True):
    """Pure-JAX mirror of the PyTorch forward for verification."""
    B, F, E = x.shape
    d = E // head_num
    q = jnp.einsum('bfe,eo->bfo', x, w_q)
    k = jnp.einsum('bfe,eo->bfo', x, w_k)
    v = jnp.einsum('bfe,eo->bfo', x, w_v)
    q = jnp.stack(jnp.split(q, head_num, axis=2))   # (H, B, F, d)
    k = jnp.stack(jnp.split(k, head_num, axis=2))
    v = jnp.stack(jnp.split(v, head_num, axis=2))
    s = jnp.einsum('hbfd,hbgd->hbfg', q, k)
    if scaling:
        s = s / (d ** 0.5)
    p = jax.nn.softmax(s, axis=-1)
    r = jnp.einsum('hbfg,hbgd->hbfd', p, v)                              # (H,B,F,d)
    r = jnp.concatenate(jnp.split(r, head_num, axis=0), axis=-1)[0]      # (B,F,E)
    if use_residual:
        r = r + jnp.einsum('bfe,eo->bfo', x, w_r)
    return jnp.tanh(r)


if __name__ == "__main__":
    B, F, E, H = 2, 8, 32, 4

    key = jax.random.PRNGKey(0)
    kx, kq, kk, kv, kr = jax.random.split(key, 5)
    x = jax.random.normal(kx, (B, F, E), dtype=jnp.float32)
    # xavier-ish weight scale keeps tanh out of saturation so the numerical
    # check is meaningful (the PyTorch init loop never re-inits nn.Parameter,
    # but the test data scale is ours to choose).
    w_scale = 0.25
    W_Q = w_scale * jax.random.normal(kq, (E, E), dtype=jnp.float32)
    W_K = w_scale * jax.random.normal(kk, (E, E), dtype=jnp.float32)
    W_V = w_scale * jax.random.normal(kv, (E, E), dtype=jnp.float32)
    W_R = w_scale * jax.random.normal(kr, (E, E), dtype=jnp.float32)

    out = multihead_attention(x, W_Q, W_K, W_V, W_R, head_num=H,
                              scaling=True, use_residual=True)
    out = jax.block_until_ready(out)

    ref = _reference(x, W_Q, W_K, W_V, W_R, head_num=H,
                     scaling=True, use_residual=True)
    assert out.shape == (B, F, E)
    # Slightly relaxed tolerance: the kernel uses the approximate EUP
    # reciprocal for the softmax denominator.
    assert jnp.allclose(out, ref, atol=1e-2, rtol=1e-2), "mismatch vs reference"

    print("KERNEL_OK")
</pallas_src>

<mosaic_0001>
module attributes {stable_mosaic.version = 11 : i64} {
  func.func @_mha_kernel(%arg0: i32, %arg1: memref<1x8x32xf32, #tpu.memory_space<vmem>>, %arg2: memref<32x128xf32, #tpu.memory_space<vmem>>, %arg3: memref<1x1x256xf32, #tpu.memory_space<vmem>>) attributes {dimension_semantics = [#tpu.dimension_semantics<parallel>], iteration_bounds = array<i64: 2>, scalar_prefetch = 0 : i64, scratch_operands = 0 : i64, tpu.core_type = #tpu.core_type<tc>, window_params = [{transform_indices = @transform_0, window_bounds = array<i64: 1, 8, 32>}, {pipeline_mode = #tpu.pipeline_mode<synchronous>, transform_indices = @transform_1, window_bounds = array<i64: 32, 128>}, {transform_indices = @transform_2, window_bounds = array<i64: 1, 1, 256>}]} {
    %c0 = arith.constant 0 : index
    %c0_0 = arith.constant 0 : index
    %c0_1 = arith.constant 0 : index
    %0 = vector.load %arg1[%c0, %c0_0, %c0_1] : memref<1x8x32xf32, #tpu.memory_space<vmem>>, vector<1x8x32xf32>
    %1 = vector.shape_cast %0 : vector<1x8x32xf32> to vector<8x32xf32>
    %c0_2 = arith.constant 0 : index
    %c0_3 = arith.constant 0 : index
    %2 = vector.load %arg2[%c0_2, %c0_3] : memref<32x128xf32, #tpu.memory_space<vmem>>, vector<32x128xf32>
    %cst = arith.constant dense<0.000000e+00> : vector<8x128xf32>
    %3 = tpu.matmul %1, %2, %cst {dimension_numbers = #tpu.dot_dimension_numbers<[1], [0], [0], [1], [0, 0, 1, 1], [], []>} : vector<8x32xf32>, vector<32x128xf32>, vector<8x128xf32> -> vector<8x128xf32>
    %4 = vector.extract_strided_slice %3 {offsets = [0, 0], sizes = [8, 32], strides = [1, 1]} : vector<8x128xf32> to vector<8x32xf32>
    %5 = vector.extract_strided_slice %3 {offsets = [0, 32], sizes = [8, 32], strides = [1, 1]} : vector<8x128xf32> to vector<8x32xf32>
    %6 = vector.extract_strided_slice %3 {offsets = [0, 64], sizes = [8, 32], strides = [1, 1]} : vector<8x128xf32> to vector<8x32xf32>
    %cst_4 = arith.constant 0.353553385 : f32
    %7 = vector.broadcast %cst_4 : f32 to vector<8x32xf32>
    %8 = arith.mulf %4, %7 : vector<8x32xf32>
    %9 = vector.shape_cast %8 : vector<8x32xf32> to vector<1x8x32xf32>
    %10 = vector.shape_cast %5 : vector<8x32xf32> to vector<1x8x32xf32>
    %11 = vector.shape_cast %6 : vector<8x32xf32> to vector<1x8x32xf32>
    %12 = vector.extract_strided_slice %9 {offsets = [0, 0, 0], sizes = [1, 8, 8], strides = [1, 1, 1]} : vector<1x8x32xf32> to vector<1x8x8xf32>
    %13 = vector.extract_strided_slice %10 {offsets = [0, 0, 0], sizes = [1, 8, 8], strides = [1, 1, 1]} : vector<1x8x32xf32> to vector<1x8x8xf32>
    %14 = vector.extract_strided_slice %11 {offsets = [0, 0, 0], sizes = [1, 8, 8], strides = [1, 1, 1]} : vector<1x8x32xf32> to vector<1x8x8xf32>
    "tpu.trace_start"() <{level = 10 : i32, message = "bfd,bgd->bfg"}> : () -> ()
    %cst_5 = arith.constant dense<0.000000e+00> : vector<1x8x8xf32>
    %15 = tpu.matmul %12, %13, %cst_5 {dimension_numbers = #tpu.dot_dimension_numbers<[2], [2], [1], [1], [0, 0, 0, 1, 1, 1], [0], [0]>} : vector<1x8x8xf32>, vector<1x8x8xf32>, vector<1x8x8xf32> -> vector<1x8x8xf32>
    "tpu.trace_stop"() : () -> ()
    %cst_6 = arith.constant dense<0xFF800000> : vector<1x8xf32>
    %16 = vector.multi_reduction <maximumf>, %15, %cst_6 [2] : vector<1x8x8xf32> to vector<1x8xf32>
    %17 = vector.shape_cast %16 : vector<1x8xf32> to vector<1x8x1xf32>
    %18 = vector.broadcast %17 : vector<1x8x1xf32> to vector<1x8x8xf32>
    %19 = arith.subf %15, %18 : vector<1x8x8xf32>
    %20 = math.exp %19 : vector<1x8x8xf32>
    %cst_7 = arith.constant dense<0.000000e+00> : vector<1x8xf32>
    %21 = vector.multi_reduction <add>, %20, %cst_7 [2] : vector<1x8x8xf32> to vector<1x8xf32>
    %22 = vector.shape_cast %21 : vector<1x8xf32> to vector<1x8x1xf32>
    %23 = tpu.reciprocal %22 {approx = true} : vector<1x8x1xf32> -> vector<1x8x1xf32>
    "tpu.trace_start"() <{level = 10 : i32, message = "bfg,bgd->bfd"}> : () -> ()
    %cst_8 = arith.constant dense<0.000000e+00> : vector<1x8x8xf32>
    %24 = tpu.matmul %20, %14, %cst_8 {dimension_numbers = #tpu.dot_dimension_numbers<[2], [1], [1], [2], [0, 0, 0, 1, 1, 2], [0], [0]>} : vector<1x8x8xf32>, vector<1x8x8xf32>, vector<1x8x8xf32> -> vector<1x8x8xf32>
    "tpu.trace_stop"() : () -> ()
    %25 = vector.broadcast %23 : vector<1x8x1xf32> to vector<1x8x8xf32>
    %26 = arith.mulf %24, %25 : vector<1x8x8xf32>
    %27 = vector.extract_strided_slice %9 {offsets = [0, 0, 8], sizes = [1, 8, 8], strides = [1, 1, 1]} : vector<1x8x32xf32> to vector<1x8x8xf32>
    %28 = vector.extract_strided_slice %10 {offsets = [0, 0, 8], sizes = [1, 8, 8], strides = [1, 1, 1]} : vector<1x8x32xf32> to vector<1x8x8xf32>
    %29 = vector.extract_strided_slice %11 {offsets = [0, 0, 8], sizes = [1, 8, 8], strides = [1, 1, 1]} : vector<1x8x32xf32> to vector<1x8x8xf32>
    "tpu.trace_start"() <{level = 10 : i32, message = "bfd,bgd->bfg"}> : () -> ()
    %cst_9 = arith.constant dense<0.000000e+00> : vector<1x8x8xf32>
    %30 = tpu.matmul %27, %28, %cst_9 {dimension_numbers = #tpu.dot_dimension_numbers<[2], [2], [1], [1], [0, 0, 0, 1, 1, 1], [0], [0]>} : vector<1x8x8xf32>, vector<1x8x8xf32>, vector<1x8x8xf32> -> vector<1x8x8xf32>
    "tpu.trace_stop"() : () -> ()
    %cst_10 = arith.constant dense<0xFF800000> : vector<1x8xf32>
    %31 = vector.multi_reduction <maximumf>, %30, %cst_10 [2] : vector<1x8x8xf32> to vector<1x8xf32>
    %32 = vector.shape_cast %31 : vector<1x8xf32> to vector<1x8x1xf32>
    %33 = vector.broadcast %32 : vector<1x8x1xf32> to vector<1x8x8xf32>
    %34 = arith.subf %30, %33 : vector<1x8x8xf32>
    %35 = math.exp %34 : vector<1x8x8xf32>
    %cst_11 = arith.constant dense<0.000000e+00> : vector<1x8xf32>
    %36 = vector.multi_reduction <add>, %35, %cst_11 [2] : vector<1x8x8xf32> to vector<1x8xf32>
    %37 = vector.shape_cast %36 : vector<1x8xf32> to vector<1x8x1xf32>
    %38 = tpu.reciprocal %37 {approx = true} : vector<1x8x1xf32> -> vector<1x8x1xf32>
    "tpu.trace_start"() <{level = 10 : i32, message = "bfg,bgd->bfd"}> : () -> ()
    %cst_12 = arith.constant dense<0.000000e+00> : vector<1x8x8xf32>
    %39 = tpu.matmul %35, %29, %cst_12 {dimension_numbers = #tpu.dot_dimension_numbers<[2], [1], [1], [2], [0, 0, 0, 1, 1, 2], [0], [0]>} : vector<1x8x8xf32>, vector<1x8x8xf32>, vector<1x8x8xf32> -> vector<1x8x8xf32>
    "tpu.trace_stop"() : () -> ()
    %40 = vector.broadcast %38 : vector<1x8x1xf32> to vector<1x8x8xf32>
    %41 = arith.mulf %39, %40 : vector<1x8x8xf32>
    %42 = vector.extract_strided_slice %9 {offsets = [0, 0, 16], sizes = [1, 8, 8], strides = [1, 1, 1]} : vector<1x8x32xf32> to vector<1x8x8xf32>
    %43 = vector.extract_strided_slice %10 {offsets = [0, 0, 16], sizes = [1, 8, 8], strides = [1, 1, 1]} : vector<1x8x32xf32> to vector<1x8x8xf32>
    %44 = vector.extract_strided_slice %11 {offsets = [0, 0, 16], sizes = [1, 8, 8], strides = [1, 1, 1]} : vector<1x8x32xf32> to vector<1x8x8xf32>
    "tpu.trace_start"() <{level = 10 : i32, message = "bfd,bgd->bfg"}> : () -> ()
    %cst_13 = arith.constant dense<0.000000e+00> : vector<1x8x8xf32>
    %45 = tpu.matmul %42, %43, %cst_13 {dimension_numbers = #tpu.dot_dimension_numbers<[2], [2], [1], [1], [0, 0, 0, 1, 1, 1], [0], [0]>} : vector<1x8x8xf32>, vector<1x8x8xf32>, vector<1x8x8xf32> -> vector<1x8x8xf32>
    "tpu.trace_stop"() : () -> ()
    %cst_14 = arith.constant dense<0xFF800000> : vector<1x8xf32>
    %46 = vector.multi_reduction <maximumf>, %45, %cst_14 [2] : vector<1x8x8xf32> to vector<1x8xf32>
    %47 = vector.shape_cast %46 : vector<1x8xf32> to vector<1x8x1xf32>
    %48 = vector.broadcast %47 : vector<1x8x1xf32> to vector<1x8x8xf32>
    %49 = arith.subf %45, %48 : vector<1x8x8xf32>
    %50 = math.exp %49 : vector<1x8x8xf32>
    %cst_15 = arith.constant dense<0.000000e+00> : vector<1x8xf32>
    %51 = vector.multi_reduction <add>, %50, %cst_15 [2] : vector<1x8x8xf32> to vector<1x8xf32>
    %52 = vector.shape_cast %51 : vector<1x8xf32> to vector<1x8x1xf32>
    %53 = tpu.reciprocal %52 {approx = true} : vector<1x8x1xf32> -> vector<1x8x1xf32>
    "tpu.trace_start"() <{level = 10 : i32, message = "bfg,bgd->bfd"}> : () -> ()
    %cst_16 = arith.constant dense<0.000000e+00> : vector<1x8x8xf32>
    %54 = tpu.matmul %50, %44, %cst_16 {dimension_numbers = #tpu.dot_dimension_numbers<[2], [1], [1], [2], [0, 0, 0, 1, 1, 2], [0], [0]>} : vector<1x8x8xf32>, vector<1x8x8xf32>, vector<1x8x8xf32> -> vector<1x8x8xf32>
    "tpu.trace_stop"() : () -> ()
    %55 = vector.broadcast %53 : vector<1x8x1xf32> to vector<1x8x8xf32>
    %56 = arith.mulf %54, %55 : vector<1x8x8xf32>
    %57 = vector.extract_strided_slice %9 {offsets = [0, 0, 24], sizes = [1, 8, 8], strides = [1, 1, 1]} : vector<1x8x32xf32> to vector<1x8x8xf32>
    %58 = vector.extract_strided_slice %10 {offsets = [0, 0, 24], sizes = [1, 8, 8], strides = [1, 1, 1]} : vector<1x8x32xf32> to vector<1x8x8xf32>
    %59 = vector.extract_strided_slice %11 {offsets = [0, 0, 24], sizes = [1, 8, 8], strides = [1, 1, 1]} : vector<1x8x32xf32> to vector<1x8x8xf32>
    "tpu.trace_start"() <{level = 10 : i32, message = "bfd,bgd->bfg"}> : () -> ()
    %cst_17 = arith.constant dense<0.000000e+00> : vector<1x8x8xf32>
    %60 = tpu.matmul %57, %58, %cst_17 {dimension_numbers = #tpu.dot_dimension_numbers<[2], [2], [1], [1], [0, 0, 0, 1, 1, 1], [0], [0]>} : vector<1x8x8xf32>, vector<1x8x8xf32>, vector<1x8x8xf32> -> vector<1x8x8xf32>
    "tpu.trace_stop"() : () -> ()
    %cst_18 = arith.constant dense<0xFF800000> : vector<1x8xf32>
    %61 = vector.multi_reduction <maximumf>, %60, %cst_18 [2] : vector<1x8x8xf32> to vector<1x8xf32>
    %62 = vector.shape_cast %61 : vector<1x8xf32> to vector<1x8x1xf32>
    %63 = vector.broadcast %62 : vector<1x8x1xf32> to vector<1x8x8xf32>
    %64 = arith.subf %60, %63 : vector<1x8x8xf32>
    %65 = math.exp %64 : vector<1x8x8xf32>
    %cst_19 = arith.constant dense<0.000000e+00> : vector<1x8xf32>
    %66 = vector.multi_reduction <add>, %65, %cst_19 [2] : vector<1x8x8xf32> to vector<1x8xf32>
    %67 = vector.shape_cast %66 : vector<1x8xf32> to vector<1x8x1xf32>
    %68 = tpu.reciprocal %67 {approx = true} : vector<1x8x1xf32> -> vector<1x8x1xf32>
    "tpu.trace_start"() <{level = 10 : i32, message = "bfg,bgd->bfd"}> : () -> ()
    %cst_20 = arith.constant dense<0.000000e+00> : vector<1x8x8xf32>
    %69 = tpu.matmul %65, %59, %cst_20 {dimension_numbers = #tpu.dot_dimension_numbers<[2], [1], [1], [2], [0, 0, 0, 1, 1, 2], [0], [0]>} : vector<1x8x8xf32>, vector<1x8x8xf32>, vector<1x8x8xf32> -> vector<1x8x8xf32>
    "tpu.trace_stop"() : () -> ()
    %70 = vector.broadcast %68 : vector<1x8x1xf32> to vector<1x8x8xf32>
    %71 = arith.mulf %69, %70 : vector<1x8x8xf32>
    %72 = tpu.concatenate %26, %41, %56, %71 in 2 : vector<1x8x8xf32>, vector<1x8x8xf32>, vector<1x8x8xf32>, vector<1x8x8xf32> -> vector<1x8x32xf32>
    %73 = vector.extract_strided_slice %3 {offsets = [0, 96], sizes = [8, 32], strides = [1, 1]} : vector<8x128xf32> to vector<8x32xf32>
    %74 = vector.shape_cast %73 : vector<8x32xf32> to vector<1x8x32xf32>
    %75 = arith.addf %72, %74 : vector<1x8x32xf32>
    %76 = math.tanh %75 : vector<1x8x32xf32>
    %77 = vector.shape_cast %76 : vector<1x8x32xf32> to vector<1x1x256xf32>
    %c0_21 = arith.constant 0 : index
    %c0_22 = arith.constant 0 : index
    %c0_23 = arith.constant 0 : index
    %78 = vector.load %arg3[%c0_21, %c0_22, %c0_23] : memref<1x1x256xf32, #tpu.memory_space<vmem>>, vector<1x1x256xf32>
    tpu.vector_store %arg3[%c0_21, %c0_22, %c0_23], %77 {strides = array<i32>} : memref<1x1x256xf32, #tpu.memory_space<vmem>>, vector<1x1x256xf32>,
    return
  }
  func.func @transform_0(%arg0: i32) -> (i32, i32, i32) {
    %c0_i32 = arith.constant 0 : i32
    %c0_i32_0 = arith.constant 0 : i32
    %c0_i32_1 = arith.constant 0 : i32
    return %arg0, %c0_i32, %c0_i32_0 : i32, i32, i32
  }
  func.func @transform_1(%arg0: i32) -> (i32, i32) {
    %c0_i32 = arith.constant 0 : i32
    %c0_i32_0 = arith.constant 0 : i32
    %c0_i32_1 = arith.constant 0 : i32
    return %c0_i32, %c0_i32_0 : i32, i32
  }
  func.func @transform_2(%arg0: i32) -> (i32, i32, i32) {
    %c0_i32 = arith.constant 0 : i32
    %c0_i32_0 = arith.constant 0 : i32
    %c0_i32_1 = arith.constant 0 : i32
    return %arg0, %c0_i32, %c0_i32_0 : i32, i32, i32
  }
}

</mosaic_0001>

<bundles_post_ra>
// kernel: tpu_custom_call.1
= control target key start
LH: loop header
LB: loop body
LE: loop exit
PB: predicated region body
PF: predicated region fallthrough
CT: control target
= control target key end

     0   :  { %7 = vsyncpa [#allocation3], 0  ;;  %s1735_s0 = inlined_call_operand.hbm [shape: f32[2,8,32], index: 0, kind: input, shape index: {}]   ;;  %s1736_s1 = inlined_call_operand.hbm [shape: f32[32,128], index: 1, kind: input, shape index: {}]   ;;  %s1737_s2 = inlined_call_operand.hbm [shape: f32[2,1,256], index: 2, kind: output, shape index: {}]  }
   0x1   :  { %9 = vsyncpa [#allocation3 + $0x1], 0 }
   0x2   :  { %10 = vsyncpa [#allocation6], 0 }
   0x3   :  { %11 = vsyncpa [#allocation4], 0 }
   0x4   :  { %13 = vsyncpa [#allocation4 + $0x1], 0  ;;  %s1498_s9 = smov 0   ;;  %s1500_s10 = smov 0  }
   0x5   :  { %s1502_s11 = smov 0   ;;  %s1504_s12 = smov 0  }
   0x6 LB: > { %s1519_s13 = sadd.s32 4294967295, %s1456_s12   ;;  %s1136_s14 = sadd.s32 4294967294, %s1456_s12   ;;  %s1456_s12 = sphi %s1504_s12, %s1759_s12   ;;  %s1452_s11 = sphi %s1502_s11, %s1758_s11   ;;  %s1448_s10 = sphi %s1500_s10, %s1757_s10   ;;  %s1444_s9 = sphi %s1498_s9, %s1756_s9  }
   0x7   : > { %p39_p0 = scmp.ne.s32.totalorder %s1448_s10, %s1444_s9  ;;  %p1738_p1 = scmp.eq.s32.totalorder %s1519_s13, 0 }
   0x8   : > { %p90_p3 = scmp.eq.s32.totalorder %s1136_s14, 1  ;;  %p1137_p5 = scmp.ge.s32.totalorder %s1456_s12, 1 }
   0x9   : > { %p1528_p4 = por %p1738_p1, %p39_p0  ;;  %p97_p7 = scmp.lt.s32.totalorder %s1456_s12, 3 }
   0xa   : > { %p1533_p6 = por %p90_p3, %p39_p0  ;;  %s1458_s18 = smov [#allocation5]  }
   0xb   : > { %s1742_s15 = scalar_select %p1528_p4, 1, 0 }
   0xc   : > { %s1743_s16 = scalar_select %p1533_p6, 1, 0 }
   0xd   : > { %p1538_p8 = pnand %p1137_p5, %p97_p7  ;;  %s109_s19 = sshll.u32 %s1458_s18, 4  ;;  %s110_s19 = int_to_ptr.vmem [resolvable:$true] %s109_s19 }
   0xe   : > { %s1552_s21 = sadd.s32 1, %s1456_s12   ;;  %s26_s22 = sadd.s32 1, %s1452_s11 }
   0xf   : > { %s1744_s17 = scalar_select %p1538_p8, 1, 0 }
  0x10   : > { %p1245_p9 = pneg %p1538_p8  ;;  %s23_s23 = ssub.s32 %s1456_s12, %s1552_s21 }
  0x11   : > { %s1345_s24 = scalar_lea.vmem %s110_s19, 512  ;;  %p1353_p5 = scmp.lt.s32.totalorder %s110_s19, %s110_s19 }
  0x12   : > { %p1547_p11 = pnand %p1245_p9, %p1738_p1  ;;  %p1346_p13 = scmp.ne.s32.totalorder %s110_s19, %s1345_s24 }
  0x13   : > { %p1354_p7 = scmp.lt.s32.totalorder %s1345_s24, %s1345_s24 }
  0x14   : > { %p1336_p12 = pneg %p1547_p11 }
  0x15   : > { %p1355_p10 = por %p1354_p7, %p1353_p5 }
  0x16   : > { %p1348_p0 = pnand %p1346_p13, %p1336_p12 }
  0x18   : > { %p1349_p3 = pneg %p1348_p0 }
  0x1a   : > { %p1356_p2 = pnand %p1355_p10, %p1349_p3 }
  0x1c   : > { %1359 = shalt.err (!%p1356_p2)
}
  0x1d   : > { %s1459_s25 = smov 128   ;;  %s1460_s26 = smov 8  }
  0x1e   : > { %1248 = dma.hbm_to_vmem [thread:$0]  (!%p1547_p11), %s1736_s1, 512, %s110_s19, [#allocation6], %s1459_s25, %s1459_s25, %s1460_s26  }
  0x1f   : > { %p24_p9 = scmp.eq.s32.totalorder %s23_s23, 0  ;;  %p33_p12 = scmp.ne.s32.totalorder %s1452_s11, %s1448_s10 }
  0x20   : > { %p34_p10 = scmp.eq.s32.totalorder %s1456_s12, 0  ;;  %p1258_p2 = scmp.lt.s32.totalorder %s1456_s12, 2 }
  0x21   : > { %s1569_s29 = scalar_select %p24_p9, %s1452_s11, %s26_s22  }
  0x22   : > { %p35_p13 = por %p34_p10, %p33_p12  ;;  %p1746_p0 = scmp.eq.s32.totalorder %s1519_s13, 1 }
  0x23   : > { %s123_s3 = sand.u32 1, %s1452_s11   ;;  %s1141_s4 = sshll.u32 %s1456_s12, 7 }
  0x24   : > { %p1573_p3 = por %p1746_p0, %p33_p12  ;;  %s1140_s5 = sshll.u32 %s123_s3, 3 }
  0x25   : > { %s1582_s8 = scalar_lea.hbm %s1735_s0, %s1141_s4  ;;  %s127_s14 = scalar_lea.vmem [#allocation2], %s1140_s5 }
  0x26   : > { %s1747_s30 = scalar_select %p1573_p3, 1, 0 }
  0x27   : > { %s134_s18 = sshll.u32 %s127_s14, 4  ;;  %p1584_p11 = pnand %p1258_p2, %p35_p13  ;;  %s135_s18 = int_to_ptr.vmem [resolvable:$true] %s134_s18 }
  0x28   : > { %s124_s20 = scalar_lea.sflag [#allocation3], %s123_s3  ;;  %s1360_s22 = scalar_lea.hbm %s1582_s8, 128 }
  0x29   : > { %p1361_p5 = scmp.ne.s32.totalorder %s1582_s8, %s1360_s22  ;;  %p1362_p7 = pneg %p1584_p11 }
  0x2a   : > { %s1365_s25 = scalar_lea.hbm %s1735_s0, 256  ;;  %p1366_p10 = scmp.lt.s32.totalorder %s1582_s8, %s1735_s0 }
  0x2b   : > { %p1363_p9 = pnand %p1362_p7, %p1361_p5  ;;  %p1367_p2 = scmp.lt.s32.totalorder %s1365_s25, %s1360_s22 }
  0x2d   : > { %p1364_p12 = pneg %p1363_p9  ;;  %p1368_p13 = por %p1367_p2, %p1366_p10 }
  0x2f   : > { %p1369_p0 = pnand %p1368_p13, %p1364_p12 }
  0x31   : > { %1372 = shalt.err (!%p1369_p0)
}
  0x32   : > { %s1373_s28 = scalar_lea.vmem %s135_s18, 128  ;;  %s1461_s3 = smov [#allocation2]  }
  0x33   : > { %p1374_p1 = scmp.ne.s32.totalorder %s135_s18, %s1373_s28  ;;  %s1378_s4 = sshll.u32 %s1461_s3, 4  ;;  %s1379_s4 = int_to_ptr.vmem [resolvable:$false] %s1378_s4 }
  0x34   : > { %s1380_s5 = scalar_lea.vmem %s1379_s4, 256  ;;  %p1381_p5 = scmp.lt.s32.totalorder %s135_s18, %s1379_s4 }
  0x35   : > { %p1376_p6 = pnand %p1374_p1, %p1362_p7  ;;  %p1382_p9 = scmp.lt.s32.totalorder %s1380_s5, %s1373_s28 }
  0x37   : > { %p1377_p3 = pneg %p1376_p6  ;;  %p1383_p4 = por %p1382_p9, %p1381_p5 }
  0x39   : > { %p1384_p8 = pnand %p1383_p4, %p1377_p3 }
  0x3b   : > { %1387 = shalt.err (!%p1384_p8)
}
  0x3c   : > { %1252 = dma.hbm_to_vmem [thread:$0]  (!%p1584_p11), %s1582_s8, 128, %s135_s18, %s124_s20  }
  0x3d   : > { %p1749_p12 = scmp.ne.s32.totalorder %s1744_s17, 0 }
  0x3e   : > { %s1605_s6 = sand.u32 (!%p1749_p12), 1, %s1448_s10   ;;  %p1750_p1 = scmp.ne.s32.totalorder (!%p1749_p12), %s1742_s15, 0 }
  0x3f   : > { %143 = sbr.rel (%p1749_p12) target bundleno = 1274 (0x4fa), region = 28  ;;  %s1143_s7 = sshll.u32 (!%p1749_p12), %s1605_s6, 3 }
  0x40   : > { %s146_s14 = scalar_lea.sflag (!%p1749_p12), [#allocation3], %s1605_s6  ;;  %s149_s22 = scalar_lea.vmem (!%p1749_p12), [#allocation2], %s1143_s7 }
  0x44   : > { %1431 = dma.done.wait (%p1750_p1), %s146_s14, 128  }
  0x45   : > { %1433 = vsyncadd (%p1750_p1), %s146_s14, 4294967168  ;;  %p1751_p4 = scmp.eq.s32.totalorder %s1519_s13, 0 }
  0x47   : > { %1435 = dma.done.wait (%p1751_p4), [#allocation6], 512   ;;  %p1752_p6 = pmov %p1751_p4 }
  0x48   : > { %v1462_v0 = vmov 0.0   ;;  %vm1463_vm0 = vmmov 0   ;;  %v178_v1 = vld [vmem:[#allocation5 + $0x18] sm:$0xff]  ;;  %v177_v2 = vld [vmem:[#allocation5 + $0x10] sm:$0xff]  ;;  %v176_v3 = vld [vmem:[#allocation5 + $0x8] sm:$0xff]  ;;  %vm179_vm1 = vcmask 261120  }
  0x49   : > { %1437 = vsyncadd (%p1752_p6), [#allocation6], 4294966784  ;;  %1186 = vmatprep.subr.mxu0 %v1462_v0  ;;  %1194 = vmatprep.mubr.msk.f32.mxu0 %vm1463_vm0, %v1462_v0  ;;  %v175_v4 = vld [vmem:[#allocation5] sm:$0xff]  ;;  %v174_v5 = vld [vmem:[%s149_s22] sm:$0xff]  ;;  %s1464_s15 = smov 96   ;;  %s1465_s17 = smov 120  }
  0x4a   : > { %1197 = vmatprep.subr.mxu1 %v1462_v0  ;;  %1199 = vmatprep.mubr.msk.f32.mxu1 %vm1463_vm0, %v1462_v0  ;;  %s1466_s8 = smov 88   ;;  %s1467_s18 = smov 80   ;;  %vm257_vm2 = vcmask 64512   ;;  %vm928_vm3 = vcmask 130048   ;;  %vm930_vm4 = vcmask 195584   ;;  %vm1011_vm5 = vcmask 523264  }
  0x4b   : > { %1187 = vmatpush3.msra.mxu0 %v178_v1  ;;  %s1468_s19 = smov 112   ;;  %s1469_s20 = smov 72   ;;  %vm1013_vm6 = vcmask 785408  }
  0x4c   : > { %1188 = vmatprep.subr.mxu0 %v1462_v0  ;;  %s1470_s23 = smov 104   ;;  %s1471_s24 = smov 56  }
  0x4d   : > { %1189 = vmatpush3.msra.mxu0 %v177_v2  ;;  %s1472_s25 = smov 64   ;;  %s1473_s26 = smov 40  }
  0x4e   : > { %1190 = vmatprep.subr.mxu0 %v1462_v0  ;;  %s1474_s27 = smov 48   ;;  %s1475_s28 = smov 8  }
  0x4f   : > { %1191 = vmatpush3.msra.mxu0 %v176_v3  ;;  %s1476_s3 = smov 32   ;;  %s1477_s4 = smov 16  }
  0x50   : > { %1192 = vmatprep.subr.mxu0 %v1462_v0  ;;  %s1478_s5 = smov 24   ;;  %s1145_s7 = sshll.u32 %s1605_s6, 1 }
  0x51   : > { %1193 = vmatpush3.msra.mxu0 %v175_v4  ;;  %s1164_s14 = sshll.u32 %s1519_s13, 5  ;;  %s173_s22 = scalar_lea.vmem [#allocation7], %s1145_s7 }
  0x52   : > { %1195 = vmatmul.mubr.msk.f32.vlgmr.msra.gmra.mxu0 %vm179_vm1, %v174_v5  ;;  %1207 = vmatprep.subr.mxu0 %v1462_v0  ;;  %p1753_p3 = scmp.ne.s32.totalorder %s1747_s30, 0 }
  0x53   : > { %1209 = vmatprep.mubr.msk.f32.mxu0 %vm1463_vm0, %v1462_v0 }
 0x112   : > { %v1630_v6 = vpop.f32.mrf.mxu0 }
 0x113   : > { %255 = vrot.lane.b32.xlu0 %v1630_v6, %s1464_s15  ;;  %v253_v7 = vmul.f32 0.35355338, %v1630_v6 }
 0x114   : > { %v1196_v8 = vpop.f32.mrf.mxu0 }
 0x115   : > { %420 = vrot.lane.b32.xlu1 %v253_v7, %s1465_s17 }
 0x117   : > { %422 = vrot.lane.b32.xlu0 %v1630_v6, %s1466_s8 }
 0x119   : > { %587 = vrot.lane.b32.xlu1 %v1630_v6, %s1467_s18  ;;  %s1054_s18 = scalar_lea.hbm %s1737_s2, %s1164_s14 }
 0x11b   : > { %585 = vrot.lane.b32.xlu0 %v253_v7, %s1468_s19  ;;  %s1042_s19 = scalar_lea.sflag [#allocation4], %s1605_s6 }
 0x11d   : > { %752 = vrot.lane.b32.xlu1 %v1630_v6, %s1469_s20 }
 0x11f   : > { %750 = vrot.lane.b32.xlu0 %v253_v7, %s1470_s23  ;;  %s1482_s23 = smov [#allocation7]  }
 0x185   : > { %v256_v9 = vpop.permute.xlu0 %255 }
 0x186   : > { %1198 = vmatpush3.xpose.msk.msra.mxu1 %vm257_vm2, %v256_v9 }
 0x187   : > { %v421_v10 = vpop.permute.xlu1 %420  ;;  %1202 = vmatprep.subr.mxu1 %v1462_v0 }
 0x189   : > { %v423_v11 = vpop.permute.xlu0 %422  ;;  %1200 = vmatmul.mubr.msk.f32.vlgmr.msra.gmra.mxu1 %vm257_vm2, %v253_v7 }
 0x18a   : > { %1208 = vmatpush3.xpose.msk.msra.mxu0 %vm257_vm2, %v423_v11  ;;  %1204 = vmatprep.mubr.msk.f32.mxu1 %vm1463_vm0, %v1462_v0 }
 0x18b   : > { %v588_v12 = vpop.permute.xlu1 %587  ;;  %1217 = vmatprep.subr.mxu0 %v1462_v0 }
 0x18d   : > { %1210 = vmatmul.mubr.msk.f32.vlgmr.msra.gmra.mxu0 %vm257_vm2, %v421_v10  ;;  %v586_v13 = vpop.permute.xlu0 %585 }
 0x18e   : > { %1218 = vmatpush3.xpose.msk.msra.mxu0 %vm257_vm2, %v588_v12  ;;  %1219 = vmatprep.mubr.msk.f32.mxu0 %vm1463_vm0, %v1462_v0 }
 0x18f   : > { %1227 = vmatprep.subr.mxu0 %v1462_v0  ;;  %v753_v14 = vpop.permute.xlu1 %752 }
 0x191   : > { %1220 = vmatmul.mubr.msk.f32.vlgmr.msra.gmra.mxu0 %vm257_vm2, %v586_v13  ;;  %v751_v15 = vpop.permute.xlu0 %750 }
 0x192   : > { %1228 = vmatpush3.xpose.msk.msra.mxu0 %vm257_vm2, %v753_v14  ;;  %1229 = vmatprep.mubr.msk.f32.mxu0 %vm1463_vm0, %v1462_v0 }
 0x195   : > { %1230 = vmatmul.mubr.msk.f32.vlgmr.msra.gmra.mxu0 %vm257_vm2, %v751_v15 }
 0x249   : > { %v329_v16 = vpop.f32.mrf.mxu1 }
 0x24a   : > { %v333_v17 = vsel %vm257_vm2, %v329_v16, -inf }
 0x24b   : > { %334 = vmax.xlane.f32.xlu1 %v333_v17  ;;  %v1201_v18 = vpop.f32.mrf.mxu1  ;;  %v1479_v17 = vmov 1983009808  }
 0x24c   : > { %v939_v18 = vunpack.c.l.s4 %v1479_v17 }
 0x24d   : > { %v494_v19 = vpop.f32.mrf.mxu0 }
 0x24e   : > { %v498_v20 = vsel %vm257_vm2, %v494_v19, -inf }
 0x24f   : > { %499 = vmax.xlane.f32.xlu0 %v498_v20  ;;  %v1211_v21 = vpop.f32.mrf.mxu0  ;;  %v1480_v20 = vmov 1934713408  }
 0x250   : > { %v954_v21 = vunpack.c.l.s4 %v1480_v20 }
 0x251   : > { %v659_v22 = vpop.f32.mrf.mxu0 }
 0x252   : > { %v663_v23 = vsel %vm257_vm2, %v659_v22, -inf }
 0x253   : > { %664 = vmax.xlane.f32.xlu0 %v663_v23  ;;  %v1221_v24 = vpop.f32.mrf.mxu0 }
 0x254   : > { %v955_v24 = vunpack.c.0.s8 %v954_v21 }
 0x255   : > { %v824_v25 = vpop.f32.mrf.mxu0 }
 0x256   : > { %v828_v27 = vsel %vm257_vm2, %v824_v25, -inf }
 0x257   : > { %v1231_v26 = vpop.f32.mrf.mxu0 }
 0x25c   : > { %508 = vrot.lane.b32.xlu1 %v1630_v6, %s1471_s24  ;;  %s1392_s24 = sshll.u32 %s1482_s23, 4  ;;  %s1393_s24 = int_to_ptr.vmem [resolvable:$false] %s1392_s24 }
 0x25d   : > { %s1394_s13 = scalar_lea.vmem %s1393_s24, 64 }
 0x269   : > { %343 = vrot.lane.b32.xlu0 %v1630_v6, %s1472_s25 }
 0x26d   : > { %838 = vrot.lane.b32.xlu0 %v1630_v6, %s1473_s26 }
 0x280   : > { %829 = vmax.xlane.f32.xlu1 %v828_v27 }
 0x291   : > { %673 = vrot.lane.b32.xlu1 %v1630_v6, %s1474_s27 }
 0x2d4   : > { %v335_v28 = vpop.xlane.xlu1 %334 }
 0x2d5   : > { %v336_v29 = vsub.f32 %v329_v16, %v335_v28 }
 0x2d7   : > { %v337_v30 = vmul.f32 1.442695, %v336_v29 }
 0x2d8   : > { %v500_v31 = vpop.xlane.xlu0 %499  ;;  %v509_v39 = vpop.permute.xlu1 %508 }
 0x2d9   : > { %1316 = vpow2.f32 %v337_v30  ;;  %v501_v32 = vsub.f32 %v494_v19, %v500_v31  ;;  %v941_v19 = vlaneseq }
 0x2db   : > { %v502_v33 = vmul.f32 1.442695, %v501_v32  ;;  %v942_v23 = vshrl.u32 %v941_v19, 7  ;;  %vm1038_vm7 = vcmp.lt.s32.totalorder %v941_v19, 256 }
 0x2dc   : > { %v665_v34 = vpop.xlane.xlu0 %664 }
 0x2dd   : > { %1318 = vpow2.f32 %v502_v33  ;;  %v666_v35 = vsub.f32 %v659_v22, %v665_v34  ;;  %v940_v22 = vunpack.c.0.s8 %v939_v18  ;;  %v958_v26 = vsub.s32 %v955_v24, %v942_v23 }
 0x2df   : > { %v667_v36 = vmul.f32 1.442695, %v666_v35 }
 0x2e0   : > { %v344_v37 = vpop.permute.xlu0 %343 }
 0x2e1   : > { %1320 = vpow2.f32 %v667_v36  ;;  %1203 = vmatpush3.msra.mxu1 %v344_v37 }
 0x2e2   : > { %1212 = vmatprep.subr.mxu1 %v1462_v0 }
 0x2e4   : > { %v839_v49 = vpop.permute.xlu0 %838 }
 0x2e6   : > { %v1317_v38 = vpop.eup %1316 }
 0x2e7   : > { %1205 = vmatmul.mubr.msk.f32.vlgmr.msra.gmra.mxu1 %vm257_vm2, %v1317_v38  ;;  %v339_v44 = vsel %vm257_vm2, %v1317_v38, 0.0 }
 0x2e8   : > { %1213 = vmatpush3.msra.mxu1 %v509_v39  ;;  %1214 = vmatprep.mubr.msk.f32.mxu1 %vm1463_vm0, %v1462_v0 }
 0x2e9   : > { %1222 = vmatprep.subr.mxu1 %v1462_v0 }
 0x2ea   : > { %v1319_v40 = vpop.eup %1318 }
 0x2eb   : > { %1215 = vmatmul.mubr.msk.f32.vlgmr.msra.gmra.mxu1 %vm257_vm2, %v1319_v40  ;;  %v504_v41 = vsel %vm257_vm2, %v1319_v40, 0.0 }
 0x2ec   : > { %505 = vadd.xlane.f32.xlu1 %v504_v41  ;;  %1224 = vmatprep.mubr.msk.f32.mxu1 %vm1463_vm0, %v1462_v0 }
 0x2ee   : > { %v1321_v42 = vpop.eup %1320 }
 0x2ef   : > { %v669_v43 = vsel %vm257_vm2, %v1321_v42, 0.0 }
 0x2f0   : > { %670 = vadd.xlane.f32.xlu0 %v669_v43  ;;  %340 = vadd.xlane.f32.xlu1 %v339_v44  ;;  %v1481_v43 = vmov 1966171168  }
 0x2f1   : > { %v1022_v44 = vunpack.c.l.s4 %v1481_v43 }
 0x309   : > { %v830_v45 = vpop.xlane.xlu1 %829 }
 0x30a   : > { %v831_v46 = vsub.f32 %v824_v25, %v830_v45  ;;  %v943_v25 = vsub.s32 %v940_v22, %v942_v23 }
 0x30c   : > { %v832_v47 = vmul.f32 1.442695, %v831_v46 }
 0x30d   : > { %v674_v48 = vpop.permute.xlu1 %673 }
 0x30e   : > { %1322 = vpow2.f32 %v832_v47  ;;  %1223 = vmatpush3.msra.mxu1 %v674_v48  ;;  %v1023_v47 = vunpack.c.0.s8 %v1022_v44 }
 0x30f   : > { %1225 = vmatmul.mubr.msk.f32.vlgmr.msra.gmra.mxu1 %vm257_vm2, %v1321_v42  ;;  %1232 = vmatprep.subr.mxu1 %v1462_v0 }
 0x310   : > { %1233 = vmatpush3.msra.mxu1 %v839_v49  ;;  %1234 = vmatprep.mubr.msk.f32.mxu1 %vm1463_vm0, %v1462_v0 }
 0x31b   : > { %v1323_v50 = vpop.eup %1322 }
 0x31c   : > { %1235 = vmatmul.mubr.msk.f32.vlgmr.msra.gmra.mxu1 %vm257_vm2, %v1323_v50  ;;  %v834_v51 = vsel %vm257_vm2, %v1323_v50, 0.0 }
 0x31d   : > { %835 = vadd.xlane.f32.xlu0 %v834_v51 }
 0x375   : > { %v506_v52 = vpop.xlane.xlu1 %505 }
 0x376   : > { %1324 = vrcp.f32 %v506_v52  ;;  %v1026_v52 = vsub.s32 %v1023_v47, %v942_v23 }
 0x379   : > { %v671_v59 = vpop.xlane.xlu0 %670  ;;  %v341_v7 = vpop.xlane.xlu1 %340 }
 0x37a   : > { %1326 = vrcp.f32 %v671_v59 }
 0x383   : > { %v1325_v55 = vpop.eup %1324 }
 0x387   : > { %v1327_v61 = vpop.eup %1326 }
 0x3a6   : > { %v836_v60 = vpop.xlane.xlu0 %835 }
 0x3a7   : > { %v415_v53 = vpop.f32.mrf.mxu1  ;;  %1328 = vrcp.f32 %v836_v60 }
 0x3a8   : > { %1330 = vrcp.f32 %v341_v7 }
 0x3a9   : > { %v1206_v54 = vpop.f32.mrf.mxu1 }
 0x3ab   : > { %v580_v56 = vpop.f32.mrf.mxu1 }
 0x3ac   : > { %v584_v57 = vmul.f32 %v1325_v55, %v580_v56 }
 0x3ad   : > { %v1216_v58 = vpop.f32.mrf.mxu1 }
 0x3ae   : > { %916 = vrot.lane.b32.xlu0 %v584_v57, %s1475_s28 }
 0x3b2   : > { %932 = vrot.lane.b32.xlu0 %v1630_v6, %s1476_s3 }
 0x3b4   : > { %v1329_v2 = vpop.eup %1328 }
 0x3b5   : > { %v1331_v6 = vpop.eup %1330 }
 0x3b6   : > { %v419_v10 = vmul.f32 %v1331_v6, %v415_v53 }
 0x3cf   : > { %v745_v62 = vpop.f32.mrf.mxu1 }
 0x3d0   : > { %v749_v63 = vmul.f32 %v1327_v61, %v745_v62 }
 0x3d1   : > { %v1226_v1 = vpop.f32.mrf.mxu1 }
 0x3d2   : > { %920 = vrot.lane.b32.xlu1 %v749_v63, %s1477_s4 }
 0x3dc   : > { %v910_v3 = vpop.f32.mrf.mxu1 }
 0x3dd   : > { %v914_v4 = vmul.f32 %v1329_v2, %v910_v3 }
 0x3de   : > { %v1236_v5 = vpop.f32.mrf.mxu1 }
 0x3df   : > { %924 = vrot.lane.b32.xlu1 %v914_v4, %s1478_s5 }
 0x420   : > { %v917_v8 = vpop.permute.xlu0 %916 }
 0x421   : > { %v927_v11 = vsel %vm257_vm2, %v419_v10, %v917_v8 }
 0x424   : > { %v933_v14 = vpop.permute.xlu0 %932 }
 0x444   : > { %v921_v9 = vpop.permute.xlu1 %920 }
 0x445   : > { %v929_v12 = vsel %vm928_vm3, %v927_v11, %v921_v9 }
 0x451   : > { %v925_v13 = vpop.permute.xlu1 %924 }
 0x452   : > { %v931_v15 = vsel %vm930_vm4, %v929_v12, %v925_v13 }
 0x453   : > { %v935_v16 = vadd.f32 %v933_v14, %v931_v15 }
 0x455   : > { %1332 = vtanh.f32 %v935_v16 }
 0x462   : > { %v1333_v27 = vpop.eup %1332 }
 0x463   : > { %v944_v28 = vrot.slane %v1333_v27, %v943_v25  ;;  %v937_v29 = vcombine.high %v1333_v27, %v1462_v0 }
 0x465   : > { %v959_v30 = vrot.slane %v944_v28, %v958_v26  ;;  %v951_v31 = vrot.slane %v937_v29, %v943_v25  ;;  %v952_v34 = vcombine.high %v944_v28, %v1462_v0 }
 0x467   : > { %v982_v32 = vcombine.high %v959_v30, %v1462_v0  ;;  %v974_v33 = vrot.slane %v951_v31, %v958_v26  ;;  %v967_v36 = vcombine.high %v951_v31, %v1462_v0  ;;  %v966_v37 = vrot.slane %v952_v34, %v958_v26 }
 0x469   : > { %987 = vrot.lane.b32.xlu1 %v982_v32, %s1476_s3  ;;  %v984_v35 = vcombine.high %v974_v33, %v1462_v0  ;;  %v981_v38 = vrot.slane %v967_v36, %v958_v26  ;;  %v983_v39 = vcombine.high %v966_v37, %v1462_v0 }
 0x46b   : > { %999 = vrot.lane.b32.xlu0 %v984_v35, %s1476_s3  ;;  %v985_v40 = vcombine.high %v981_v38, %v1462_v0 }
 0x46d   : > { %991 = vrot.lane.b32.xlu1 %v966_v37, %s1472_s25 }
 0x46f   : > { %1003 = vrot.lane.b32.xlu0 %v981_v38, %s1472_s25 }
 0x471   : > { %995 = vrot.lane.b32.xlu1 %v983_v39, %s1464_s15 }
 0x473   : > { %1007 = vrot.lane.b32.xlu0 %v985_v40, %s1464_s15  ;;  %s1056_s15 = sshll.u32 %s173_s22, 4  ;;  %s1057_s15 = int_to_ptr.vmem [resolvable:$true] %s1056_s15 }
 0x474   : > { %s1388_s20 = scalar_lea.vmem %s1057_s15, 32  ;;  %p1395_p10 = scmp.lt.s32.totalorder %s1057_s15, %s1393_s24 }
 0x475   : > { %p1389_p8 = scmp.ne.s32.totalorder %s1057_s15, %s1388_s20  ;;  %p1396_p2 = scmp.lt.s32.totalorder %s1394_s13, %s1388_s20 }
 0x477   : > { %p1390_p11 = pnand %p1389_p8, %p1753_p3  ;;  %p1397_p13 = por %p1396_p2, %p1395_p10 }
 0x479   : > { %p1391_p7 = pneg %p1390_p11 }
 0x47b   : > { %p1398_p0 = pnand %p1397_p13, %p1391_p7 }
 0x4db   : > { %v988_v41 = vpop.permute.xlu1 %987 }
 0x4dc   : > { %v1010_v49 = vsel %vm179_vm1, %v959_v30, %v988_v41 }
 0x4dd   : > { %v1000_v42 = vpop.permute.xlu0 %999 }
 0x4de   : > { %v1015_v50 = vsel %vm179_vm1, %v974_v33, %v1000_v42 }
 0x4df   : > { %v992_v45 = vpop.permute.xlu1 %991 }
 0x4e0   : > { %v1012_v51 = vsel %vm1011_vm5, %v1010_v49, %v992_v45 }
 0x4e1   : > { %v1004_v46 = vpop.permute.xlu0 %1003 }
 0x4e2   : > { %v1016_v0 = vsel %vm1011_vm5, %v1015_v50, %v1004_v46 }
 0x4e3   : > { %v996_v48 = vpop.permute.xlu1 %995 }
 0x4e4   : > { %v1014_v54 = vsel %vm1013_vm6, %v1012_v51, %v996_v48 }
 0x4e5   : > { %v1008_v53 = vpop.permute.xlu0 %1007 }
 0x4e6   : > { %v1017_v55 = vsel %vm1013_vm6, %v1016_v0, %v1008_v53 }
 0x4e7   : > { %v1020_v56 = vcombine.low %v1014_v54, %v1017_v55 }
 0x4e9   : > { %v1027_v57 = vrot.slane %v1020_v56, %v1026_v52 }
 0x4eb   : > { %v1034_v58 = vrot.slane %v1027_v57, %v1026_v52 }
 0x4ed   : > { %1040 = vst.msk [vmem:[%s173_s22] sm:$0x3] %vm1038_vm7, %v1034_v58 }
 0x4ee   : > { %1401 = shalt.err (!%p1398_p0)
}
 0x4ef   : > { %s1402_s25 = scalar_lea.hbm %s1054_s18, 32  ;;  %s1406_s27 = scalar_lea.hbm %s1737_s2, 64 }
 0x4f0   : > { %p1403_p5 = scmp.ne.s32.totalorder %s1054_s18, %s1402_s25  ;;  %p1407_p1 = scmp.lt.s32.totalorder %s1054_s18, %s1737_s2 }
 0x4f1   : > { %p1408_p4 = scmp.lt.s32.totalorder %s1406_s27, %s1402_s25 }
 0x4f2   : > { %p1404_p9 = pnand %p1403_p5, %p1753_p3 }
 0x4f3   : > { %p1409_p6 = por %p1408_p4, %p1407_p1 }
 0x4f4   : > { %p1405_p12 = pneg %p1404_p9 }
 0x4f6   : > { %p1410_p8 = pnand %p1409_p6, %p1405_p12 }
 0x4f8   : > { %1413 = shalt.err (!%p1410_p8)
}
 0x4f9   : > { %1243 = dma.vmem_to_hbm [thread:$0]  (%p1753_p3), %s1057_s15, 32, %s1054_s18, %s1042_s19  }
 0x4fa PF: > { %s1068_s4 = sand.u32 1, %s1444_s9   ;;  %p1754_p11 = scmp.ne.s32.totalorder %s1743_s16, 0 }
 0x4fb   : > { %p1755_p7 = scmp.ge.s32.totalorder %s1456_s12, 2  ;;  %s1069_s5 = scalar_lea.sflag [#allocation4], %s1068_s4 }
 0x4fd   : > { %p1254_p10 = pnand %p1755_p7, %p1754_p11 }
 0x4ff   : > { %p1255_p2 = pneg %p1254_p10 }
 0x501   : > { %1439 = dma.done.wait (%p1255_p2), %s1069_s5, 32  }
 0x502   : > { %1441 = vsyncadd (%p1255_p2), %s1069_s5, 4294967264  ;;  %p16_p13 = scmp.ge.s32.totalorder %s1552_s21, 4   ;;  %s1756_s9 = smov %s1448_s10 }
 0x503   : > { %s1757_s10 = smov %s1452_s11  ;;  %s1758_s11 = smov %s1569_s29 }
 0x504   : > { %s1759_s12 = smov %s1552_s21  ;;  %18 = sbr.rel (!%p16_p13) target bundleno = 6 (0x6), region = 77 }
 0x509   :  { %1074 = vsyncpa [#allocation3], 1 }
 0x50a   :  { %1076 = vsyncpa [#allocation3 + $0x1], 1 }
 0x50b   :  { %1077 = vsyncpa [#allocation6], 1 }
 0x50c   :  { %1078 = vsyncpa [#allocation4], 1 }
 0x50d   :  { %1080 = vsyncpa [#allocation4 + $0x1], 1 }

</bundles_post_ra>
